<compile_context>
chip_gen: v5e
topology: v5e:2x2
jax: 0.10.0
libtpu: 0.0.40
codegen_flags: <defaults>
</compile_context>

<pallas_src>
import jax
import jax.numpy as jnp
import numpy as np
from jax.experimental import pallas as pl
from jax.experimental.pallas import tpu as pltpu


def _round_up(x, m):
    return -(-x // m) * m


# ----------------------------------------------------------------------------
# Parameter construction (glue, plain JAX / numpy)
# ----------------------------------------------------------------------------
def _make_spectemp_params(key, num_filts, n_f, n_t, zero_pad):
    """Synthetic spectro-temporal filters shaped like the torch buffer
    `all_Hts`: (K, Hp, Wp, 2) with real/imag stacked on the last axis."""
    # TODO(synk): real model builds these with spectemp.make_Hts_filterbank
    # (Chi-Ru-Shamma 2002); helper not provided, so use deterministic random
    # complex filters of the same shape.
    hp = n_f + zero_pad[1]
    wp = n_t + zero_pad[0]
    kr, ki = jax.random.split(key)
    hr = jax.random.normal(kr, (num_filts, hp, wp), dtype=jnp.float32)
    hi = jax.random.normal(ki, (num_filts, hp, wp), dtype=jnp.float32)
    return jnp.stack([hr, hi], axis=-1)


def _make_row_idft_mat(hp, n_f, nfp):
    """Fused row-side inverse-DFT matrix GROW = [[Gr, -Gi], [Gi, Gr]] of shape
    (2*NFp, 2*Hp) with Gr/Gi = cos/sin(2*pi*m*u/Hp), truncated to m < N_F and
    zero-padded to NFp rows per half, so [rr; ri] = GROW @ [pr; qi]."""
    m = np.arange(n_f, dtype=np.float64)
    u = np.arange(hp, dtype=np.float64)
    theta = 2.0 * np.pi * np.outer(m, u) / hp
    gr = np.zeros((nfp, hp), np.float64)
    gi = np.zeros((nfp, hp), np.float64)
    gr[:n_f] = np.cos(theta)
    gi[:n_f] = np.sin(theta)
    grow = np.block([[gr, -gi], [gi, gr]]).astype(np.float32)
    return jnp.asarray(grow)


def _make_col_idft_mat(wp, wpp, n_t, inv_hw):
    """Fused column-side inverse-DFT matrix GCOL (2*Wpp, N_T):
        rows [0:Wp)        =  cos(2*pi*v*t/Wp) / (Hp*Wp)
        rows [Wpp:Wpp+Wp)  = -sin(2*pi*v*t/Wp) / (Hp*Wp)
    (zero rows elsewhere match the lane zero-padding Wp -> Wpp), so
        y = [rr | ri] @ GCOL = (rr @ Gcr - ri @ Gci) / (Hp*Wp)."""
    v = np.arange(wp, dtype=np.float64)
    t = np.arange(n_t, dtype=np.float64)
    beta = 2.0 * np.pi * np.outer(v, t) / wp
    gcol = np.zeros((2 * wpp, n_t), np.float64)
    gcol[:wp] = np.cos(beta) * inv_hw
    gcol[wpp:wpp + wp] = -np.sin(beta) * inv_hw
    return jnp.asarray(gcol.astype(np.float32))


def _make_pool_selector(kb, nfp, inv_ft):
    """Block-diagonal pooling selector (kb, kb*NFp) with 1/(N_F*N_T) folded in:
    SEL @ power sums each filter's NFp rows and applies the pooling mean."""
    sel = np.zeros((kb, kb * nfp), np.float32)
    for k in range(kb):
        sel[k, k * nfp:(k + 1) * nfp] = inv_ft
    return jnp.asarray(sel)


def _vmem_capacity_bytes():
    try:
        return int(pltpu.get_tpu_info().vmem_capacity_bytes)
    except Exception:   # hardware query unavailable: assume v5e/v6e capacity
        return 128 << 20


def _const_spec(shape):
    """Single-buffered constant operand (never re-fetched across the grid)."""
    ndim = len(shape)
    index_map = lambda bi, ki: (0,) * ndim
    try:
        return pl.BlockSpec(shape, index_map, pipeline_mode=pl.Buffered(1))
    except (AttributeError, TypeError):
        # Older Pallas without pipeline_mode: fall back to default buffering.
        return pl.BlockSpec(shape, index_map)


# ----------------------------------------------------------------------------
# Pallas kernel: one (batch, filter-block) grid point per invocation
# ----------------------------------------------------------------------------
def _spectemp_kernel(*, kb, wpp, nfp, pad_corr):
    def kernel(xr_ref, xi_ref, hr_ref, hi_ref, grow_ref, gcol_ref, sel_ref,
               out_ref):
        # Broadcast this batch's FFT across the kb lane-stacked filter chunks
        # (chunk k occupies lanes [k*Wpp, (k+1)*Wpp), Wpp a multiple of 128).
        xr = jnp.concatenate([xr_ref[0]] * kb, axis=1)      # (Hp, kb*Wpp)
        xi = jnp.concatenate([xi_ref[0]] * kb, axis=1)
        hr = hr_ref[0].astype(jnp.float32)                   # bf16 -> f32
        hi = hi_ref[0].astype(jnp.float32)

        # ApplyFiltInFourier2D: pointwise complex multiply X * H for all kb
        # filters at once (VPU).
        pr = xr * hr - xi * hi
        qi = xr * hi + xi * hr
        p = jnp.concatenate([pr, qi], axis=0)                # (2*Hp, kb*Wpp)

        # Fused row-side inverse DFT: one MXU matmul, K = 2*Hp, N = kb*Wpp.
        r = jnp.dot(grow_ref[...], p,
                    preferred_element_type=jnp.float32)      # (2*NFp, kb*Wpp)

        # Relayout: filter chunks from lanes to sublanes, [rr | ri] fused on
        # lanes.  All offsets are multiples of (8, 128) -> plain VMEM copies.
        rr_stack = jnp.concatenate(
            [r[:nfp, k * wpp:(k + 1) * wpp] for k in range(kb)], axis=0)
        ri_stack = jnp.concatenate(
            [r[nfp:, k * wpp:(k + 1) * wpp] for k in range(kb)], axis=0)
        rstack = jnp.concatenate([rr_stack, ri_stack], axis=1)  # (kb*NFp, 2*Wpp)

        # Fused column-side inverse DFT (real part only; 1/(Hp*Wp) folded into
        # GCOL): one MXU matmul, M = kb*NFp, K = 2*Wpp, N = N_T.
        y = jnp.dot(rstack, gcol_ref[...],
                    preferred_element_type=jnp.float32)      # (kb*NFp, N_T)

        # SquareReal (clamp min 1e-8) + AdaptiveAvgPool2d((1, 1)); the mean
        # normalization is folded into the block-diagonal selector.  The
        # (NFp - N_F) zero rows per filter each contribute clamp(0,1e-8);
        # pad_corr removes that constant exactly.
        power = jnp.maximum(y * y, 1e-8)
        pooled = jnp.dot(sel_ref[...], power,
                         preferred_element_type=jnp.float32)  # (kb, N_T)
        tsum = jnp.sum(pooled, axis=1, keepdims=True) - pad_corr  # (kb, 1)

        out_ref[...] = tsum.reshape(1, 1, kb, 1)

    return kernel


# ----------------------------------------------------------------------------
# Wrapper (SpectTempFilts.forward, time_average=False, linear_eval=False)
# ----------------------------------------------------------------------------
def spectemp_filts_forward(x, all_hts, *, n_f, n_t, zero_pad,
                           coch_rescale_factor=100.0, filt_block=8,
                           filt_dtype=jnp.bfloat16):
    b = x.shape[0]
    assert x.shape[1] == 1 and x.shape[2] == n_f and x.shape[3] == n_t
    k_filts = all_hts.shape[0]
    hp = n_f + zero_pad[1]
    wp = n_t + zero_pad[0]
    wpp = _round_up(wp, 128)          # lane-dense padded time axis
    nfp = _round_up(n_f, 8)           # sublane-aligned cropped freq axis
    kb = min(filt_block, k_filts)
    kpad = _round_up(k_filts, kb)
    n_kblocks = kpad // kb

    inv_hw = 1.0 / float(hp * wp)     # torch.ifft normalization (FFT size!)
    inv_ft = 1.0 / float(n_f * n_t)   # AdaptiveAvgPool2d((1, 1))
    pad_corr = (nfp - n_f) * n_t * 1e-8 * inv_ft

    # -- wrapper glue: coch rescale, ConstantPad2d, forward FFT (hoisted) ----
    xs = (x * coch_rescale_factor)[:, 0]                               # (B,N_F,N_T)
    x_pad = jnp.pad(xs, ((0, 0), (0, zero_pad[1]), (0, zero_pad[0])))  # (B,Hp,Wp)
    x_fft = jnp.fft.fft2(x_pad)                                        # complex64
    lane_pad = ((0, 0), (0, 0), (0, wpp - wp))
    xr = jnp.pad(jnp.real(x_fft).astype(jnp.float32), lane_pad)        # (B,Hp,Wpp)
    xi = jnp.pad(jnp.imag(x_fft).astype(jnp.float32), lane_pad)

    # -- filters: pad K -> Kpad and Wp -> Wpp, lane-stack kb per block, bf16 --
    def _prep_filt(h):
        h = jnp.pad(h, ((0, kpad - k_filts), (0, 0), (0, wpp - wp)))
        h = h.reshape(n_kblocks, kb, hp, wpp).transpose(0, 2, 1, 3)
        return h.reshape(n_kblocks, hp, kb * wpp).astype(filt_dtype)

    hr = _prep_filt(all_hts[..., 0])
    hi = _prep_filt(all_hts[..., 1])

    # -- fused inverse-DFT constants and pooling selector ---------------------
    grow = _make_row_idft_mat(hp, n_f, nfp)            # (2*NFp, 2*Hp)
    gcol = _make_col_idft_mat(wp, wpp, n_t, inv_hw)    # (2*Wpp, N_T)
    sel = _make_pool_selector(kb, nfp, inv_ft)         # (kb, kb*NFp)

    # -- VMEM budget, clamped to the running chip's capacity ------------------
    filt_bytes = jnp.dtype(filt_dtype).itemsize
    need = (2 * 2 * hp * wpp * 4                       # xr, xi (double-buffered)
            + 2 * 2 * hp * kb * wpp * filt_bytes       # hr, hi (double-buffered)
            + (grow.size + gcol.size + sel.size) * 4   # single-buffered consts
            + 2 * (2 * hp + 2 * nfp) * kb * wpp * 4    # p, r working slabs
            + 2 * kb * nfp * (2 * wpp + n_t) * 4       # rstack, y
            + (8 << 20))                               # headroom
    vmem_limit = int(min(max(need, 32 << 20),
                         _vmem_capacity_bytes() - (16 << 20)))

    grid_spec = pltpu.PrefetchScalarGridSpec(
        num_scalar_prefetch=0,
        grid=(b, n_kblocks),                           # filter blocks innermost
        in_specs=[
            pl.BlockSpec((1, hp, wpp), lambda bi, ki: (bi, 0, 0)),       # Re FFT(x)
            pl.BlockSpec((1, hp, wpp), lambda bi, ki: (bi, 0, 0)),       # Im FFT(x)
            pl.BlockSpec((1, hp, kb * wpp), lambda bi, ki: (ki, 0, 0)),  # hr block
            pl.BlockSpec((1, hp, kb * wpp), lambda bi, ki: (ki, 0, 0)),  # hi block
            _const_spec((2 * nfp, 2 * hp)),                              # GROW
            _const_spec((2 * wpp, n_t)),                                 # GCOL
            _const_spec((kb, kb * nfp)),                                 # SEL
        ],
        out_specs=pl.BlockSpec((1, 1, kb, 1), lambda bi, ki: (bi, ki, 0, 0)),
    )

    out = pl.pallas_call(
        _spectemp_kernel(kb=kb, wpp=wpp, nfp=nfp, pad_corr=pad_corr),
        out_shape=jax.ShapeDtypeStruct((b, n_kblocks, kb, 1), jnp.float32),
        grid_spec=grid_spec,
        compiler_params=pltpu.CompilerParams(
            dimension_semantics=("parallel", "parallel"),
            vmem_limit_bytes=vmem_limit),
    )(xr, xi, hr, hi, grow, gcol, sel)

    # (B, KBlocks, kb, 1) -> (B, K, 1, 1) matching the torch module output.
    return out.reshape(b, kpad)[:, :k_filts].reshape(b, k_filts, 1, 1)


# ----------------------------------------------------------------------------
# Pure-JAX reference (jnp.fft), for correctness validation only
# ----------------------------------------------------------------------------
def _reference(x, all_hts, n_f, n_t, zero_pad, rescale):
    xs = (x * rescale)[:, 0]
    x_pad = jnp.pad(xs, ((0, 0), (0, zero_pad[1]), (0, zero_pad[0])))
    x_fft = jnp.fft.fft2(x_pad)[:, None]                    # (B,1,Hp,Wp) complex
    h = all_hts[..., 0] + 1j * all_hts[..., 1]              # (K,Hp,Wp) complex
    y = jnp.fft.ifft2(x_fft * h[None])
    y_real = jnp.real(y)[:, :, :n_f, :n_t]
    power = jnp.maximum(y_real ** 2, 1e-8)
    return jnp.mean(power, axis=(2, 3), keepdims=True)


if __name__ == "__main__":
    key = jax.random.PRNGKey(0)
    n_f, n_t = 16, 16                   # small cochleagram (freq, time)
    zero_pad = (2 * n_t, n_f)           # same convention as SpecTempFilterBank
    num_filts = 8
    batch = 2
    coch_rescale_factor = 100.0

    k_x, k_h = jax.random.split(key)
    x = jax.random.normal(k_x, (batch, 1, n_f, n_t), dtype=jnp.float32) * 0.01
    all_hts = _make_spectemp_params(k_h, num_filts, n_f, n_t, zero_pad)

    out = spectemp_filts_forward(x, all_hts, n_f=n_f, n_t=n_t,
                                 zero_pad=zero_pad,
                                 coch_rescale_factor=coch_rescale_factor,
                                 filt_block=8)
    out = jax.block_until_ready(out)
    assert out.shape == (batch, num_filts, 1, 1)

    ref = jax.block_until_ready(
        _reference(x, all_hts, n_f, n_t, zero_pad, coch_rescale_factor))

    # Default MXU precision (bf16 operand passes) + bf16 filter storage put the
    # pooled-power relative error in the ~1% range; validate at 5%.
    o = np.asarray(out)
    r = np.asarray(ref)
    if not np.allclose(o, r, rtol=5e-2, atol=1e-6):
        rel = np.max(np.abs(o - r) / (np.abs(r) + 1e-6))
        raise AssertionError(
            f"Pallas output mismatch vs reference (max rel err {rel:.3e})")

    print("KERNEL_OK")
</pallas_src>

<mosaic_0001>
module attributes {stable_mosaic.version = 11 : i64} {
  func.func @kernel(%arg0: i32, %arg1: i32, %arg2: memref<1x32x128xf32, #tpu.memory_space<vmem>>, %arg3: memref<1x32x128xf32, #tpu.memory_space<vmem>>, %arg4: memref<1x32x1024xbf16, #tpu.memory_space<vmem>>, %arg5: memref<1x32x1024xbf16, #tpu.memory_space<vmem>>, %arg6: memref<32x64xf32, #tpu.memory_space<vmem>>, %arg7: memref<256x16xf32, #tpu.memory_space<vmem>>, %arg8: memref<8x128xf32, #tpu.memory_space<vmem>>, %arg9: memref<1x1x8x1xf32, #tpu.memory_space<vmem>>) attributes {dimension_semantics = [#tpu.dimension_semantics<parallel>, #tpu.dimension_semantics<parallel>], iteration_bounds = array<i64: 2, 1>, scalar_prefetch = 0 : i64, scratch_operands = 0 : i64, tpu.core_type = #tpu.core_type<tc>, window_params = [{transform_indices = @transform_0, window_bounds = array<i64: 1, 32, 128>}, {transform_indices = @transform_1, window_bounds = array<i64: 1, 32, 128>}, {transform_indices = @transform_2, window_bounds = array<i64: 1, 32, 1024>}, {transform_indices = @transform_3, window_bounds = array<i64: 1, 32, 1024>}, {pipeline_mode = #tpu.pipeline_mode<synchronous>, transform_indices = @transform_4, window_bounds = array<i64: 32, 64>}, {pipeline_mode = #tpu.pipeline_mode<synchronous>, transform_indices = @transform_5, window_bounds = array<i64: 256, 16>}, {pipeline_mode = #tpu.pipeline_mode<synchronous>, transform_indices = @transform_6, window_bounds = array<i64: 8, 128>}, {transform_indices = @transform_7, window_bounds = array<i64: 1, 1, 8, 1>}]} {
    %c0 = arith.constant 0 : index
    %c0_0 = arith.constant 0 : index
    %c0_1 = arith.constant 0 : index
    %0 = vector.load %arg2[%c0, %c0_0, %c0_1] : memref<1x32x128xf32, #tpu.memory_space<vmem>>, vector<1x32x128xf32>
    %1 = vector.shape_cast %0 : vector<1x32x128xf32> to vector<32x128xf32>
    %2 = tpu.concatenate %1, %1, %1, %1, %1, %1, %1, %1 in 1 : vector<32x128xf32>, vector<32x128xf32>, vector<32x128xf32>, vector<32x128xf32>, vector<32x128xf32>, vector<32x128xf32>, vector<32x128xf32>, vector<32x128xf32> -> vector<32x1024xf32>
    %c0_2 = arith.constant 0 : index
    %c0_3 = arith.constant 0 : index
    %c0_4 = arith.constant 0 : index
    %3 = vector.load %arg3[%c0_2, %c0_3, %c0_4] : memref<1x32x128xf32, #tpu.memory_space<vmem>>, vector<1x32x128xf32>
    %4 = vector.shape_cast %3 : vector<1x32x128xf32> to vector<32x128xf32>
    %5 = tpu.concatenate %4, %4, %4, %4, %4, %4, %4, %4 in 1 : vector<32x128xf32>, vector<32x128xf32>, vector<32x128xf32>, vector<32x128xf32>, vector<32x128xf32>, vector<32x128xf32>, vector<32x128xf32>, vector<32x128xf32> -> vector<32x1024xf32>
    %c0_5 = arith.constant 0 : index
    %c0_6 = arith.constant 0 : index
    %c0_7 = arith.constant 0 : index
    %6 = vector.load %arg4[%c0_5, %c0_6, %c0_7] : memref<1x32x1024xbf16, #tpu.memory_space<vmem>>, vector<1x32x1024xbf16>
    %7 = vector.shape_cast %6 : vector<1x32x1024xbf16> to vector<32x1024xbf16>
    %8 = arith.extf %7 : vector<32x1024xbf16> to vector<32x1024xf32>
    %c0_8 = arith.constant 0 : index
    %c0_9 = arith.constant 0 : index
    %c0_10 = arith.constant 0 : index
    %9 = vector.load %arg5[%c0_8, %c0_9, %c0_10] : memref<1x32x1024xbf16, #tpu.memory_space<vmem>>, vector<1x32x1024xbf16>
    %10 = vector.shape_cast %9 : vector<1x32x1024xbf16> to vector<32x1024xbf16>
    %11 = arith.extf %10 : vector<32x1024xbf16> to vector<32x1024xf32>
    %12 = arith.mulf %2, %8 : vector<32x1024xf32>
    %13 = arith.mulf %5, %11 : vector<32x1024xf32>
    %14 = arith.subf %12, %13 : vector<32x1024xf32>
    %15 = arith.mulf %2, %11 : vector<32x1024xf32>
    %16 = arith.mulf %5, %8 : vector<32x1024xf32>
    %17 = arith.addf %15, %16 : vector<32x1024xf32>
    %18 = tpu.concatenate %14, %17 in 0 : vector<32x1024xf32>, vector<32x1024xf32> -> vector<64x1024xf32>
    %c0_11 = arith.constant 0 : index
    %c0_12 = arith.constant 0 : index
    %19 = vector.load %arg6[%c0_11, %c0_12] : memref<32x64xf32, #tpu.memory_space<vmem>>, vector<32x64xf32>
    %cst = arith.constant dense<0.000000e+00> : vector<32x1024xf32>
    %20 = tpu.matmul %19, %18, %cst {dimension_numbers = #tpu.dot_dimension_numbers<[1], [0], [0], [1], [0, 0, 1, 1], [], []>} : vector<32x64xf32>, vector<64x1024xf32>, vector<32x1024xf32> -> vector<32x1024xf32>
    %21 = vector.extract_strided_slice %20 {offsets = [0, 0], sizes = [16, 128], strides = [1, 1]} : vector<32x1024xf32> to vector<16x128xf32>
    %22 = vector.extract_strided_slice %20 {offsets = [0, 128], sizes = [16, 128], strides = [1, 1]} : vector<32x1024xf32> to vector<16x128xf32>
    %23 = vector.extract_strided_slice %20 {offsets = [0, 256], sizes = [16, 128], strides = [1, 1]} : vector<32x1024xf32> to vector<16x128xf32>
    %24 = vector.extract_strided_slice %20 {offsets = [0, 384], sizes = [16, 128], strides = [1, 1]} : vector<32x1024xf32> to vector<16x128xf32>
    %25 = vector.extract_strided_slice %20 {offsets = [0, 512], sizes = [16, 128], strides = [1, 1]} : vector<32x1024xf32> to vector<16x128xf32>
    %26 = vector.extract_strided_slice %20 {offsets = [0, 640], sizes = [16, 128], strides = [1, 1]} : vector<32x1024xf32> to vector<16x128xf32>
    %27 = vector.extract_strided_slice %20 {offsets = [0, 768], sizes = [16, 128], strides = [1, 1]} : vector<32x1024xf32> to vector<16x128xf32>
    %28 = vector.extract_strided_slice %20 {offsets = [0, 896], sizes = [16, 128], strides = [1, 1]} : vector<32x1024xf32> to vector<16x128xf32>
    %29 = tpu.concatenate %21, %22, %23, %24, %25, %26, %27, %28 in 0 : vector<16x128xf32>, vector<16x128xf32>, vector<16x128xf32>, vector<16x128xf32>, vector<16x128xf32>, vector<16x128xf32>, vector<16x128xf32>, vector<16x128xf32> -> vector<128x128xf32>
    %30 = vector.extract_strided_slice %20 {offsets = [16, 0], sizes = [16, 128], strides = [1, 1]} : vector<32x1024xf32> to vector<16x128xf32>
    %31 = vector.extract_strided_slice %20 {offsets = [16, 128], sizes = [16, 128], strides = [1, 1]} : vector<32x1024xf32> to vector<16x128xf32>
    %32 = vector.extract_strided_slice %20 {offsets = [16, 256], sizes = [16, 128], strides = [1, 1]} : vector<32x1024xf32> to vector<16x128xf32>
    %33 = vector.extract_strided_slice %20 {offsets = [16, 384], sizes = [16, 128], strides = [1, 1]} : vector<32x1024xf32> to vector<16x128xf32>
    %34 = vector.extract_strided_slice %20 {offsets = [16, 512], sizes = [16, 128], strides = [1, 1]} : vector<32x1024xf32> to vector<16x128xf32>
    %35 = vector.extract_strided_slice %20 {offsets = [16, 640], sizes = [16, 128], strides = [1, 1]} : vector<32x1024xf32> to vector<16x128xf32>
    %36 = vector.extract_strided_slice %20 {offsets = [16, 768], sizes = [16, 128], strides = [1, 1]} : vector<32x1024xf32> to vector<16x128xf32>
    %37 = vector.extract_strided_slice %20 {offsets = [16, 896], sizes = [16, 128], strides = [1, 1]} : vector<32x1024xf32> to vector<16x128xf32>
    %38 = tpu.concatenate %30, %31, %32, %33, %34, %35, %36, %37 in 0 : vector<16x128xf32>, vector<16x128xf32>, vector<16x128xf32>, vector<16x128xf32>, vector<16x128xf32>, vector<16x128xf32>, vector<16x128xf32>, vector<16x128xf32> -> vector<128x128xf32>
    %39 = tpu.concatenate %29, %38 in 1 : vector<128x128xf32>, vector<128x128xf32> -> vector<128x256xf32>
    %c0_13 = arith.constant 0 : index
    %c0_14 = arith.constant 0 : index
    %40 = vector.load %arg7[%c0_13, %c0_14] : memref<256x16xf32, #tpu.memory_space<vmem>>, vector<256x16xf32>
    %cst_15 = arith.constant dense<0.000000e+00> : vector<128x16xf32>
    %41 = tpu.matmul %39, %40, %cst_15 {dimension_numbers = #tpu.dot_dimension_numbers<[1], [0], [0], [1], [0, 0, 1, 1], [], []>} : vector<128x256xf32>, vector<256x16xf32>, vector<128x16xf32> -> vector<128x16xf32>
    %42 = arith.mulf %41, %41 : vector<128x16xf32>
    %cst_16 = arith.constant 9.99999993E-9 : f32
    %43 = vector.broadcast %cst_16 : f32 to vector<128x16xf32>
    %44 = arith.maximumf %42, %43 : vector<128x16xf32>
    %c0_17 = arith.constant 0 : index
    %c0_18 = arith.constant 0 : index
    %45 = vector.load %arg8[%c0_17, %c0_18] : memref<8x128xf32, #tpu.memory_space<vmem>>, vector<8x128xf32>
    %cst_19 = arith.constant dense<0.000000e+00> : vector<8x16xf32>
    %46 = tpu.matmul %45, %44, %cst_19 {dimension_numbers = #tpu.dot_dimension_numbers<[1], [0], [0], [1], [0, 0, 1, 1], [], []>} : vector<8x128xf32>, vector<128x16xf32>, vector<8x16xf32> -> vector<8x16xf32>
    %cst_20 = arith.constant dense<0.000000e+00> : vector<8xf32>
    %47 = vector.multi_reduction <add>, %46, %cst_20 [1] : vector<8x16xf32> to vector<8xf32>
    %48 = vector.shape_cast %47 : vector<8xf32> to vector<8x1xf32>
    %cst_21 = arith.constant 0.000000e+00 : f32
    %49 = vector.broadcast %cst_21 : f32 to vector<8x1xf32>
    %50 = arith.subf %48, %49 : vector<8x1xf32>
    %51 = vector.shape_cast %50 : vector<8x1xf32> to vector<1x1x8x1xf32>
    %c0_22 = arith.constant 0 : index
    %c0_23 = arith.constant 0 : index
    %c0_24 = arith.constant 0 : index
    %c0_25 = arith.constant 0 : index
    %52 = vector.load %arg9[%c0_22, %c0_23, %c0_24, %c0_25] : memref<1x1x8x1xf32, #tpu.memory_space<vmem>>, vector<1x1x8x1xf32>
    tpu.vector_store %arg9[%c0_22, %c0_23, %c0_24, %c0_25], %51 {strides = array<i32>} : memref<1x1x8x1xf32, #tpu.memory_space<vmem>>, vector<1x1x8x1xf32>,
    return
  }
  func.func @transform_0(%arg0: i32, %arg1: i32) -> (i32, i32, i32) {
    %c0_i32 = arith.constant 0 : i32
    %c0_i32_0 = arith.constant 0 : i32
    %c0_i32_1 = arith.constant 0 : i32
    return %arg0, %c0_i32, %c0_i32_0 : i32, i32, i32
  }
  func.func @transform_1(%arg0: i32, %arg1: i32) -> (i32, i32, i32) {
    %c0_i32 = arith.constant 0 : i32
    %c0_i32_0 = arith.constant 0 : i32
    %c0_i32_1 = arith.constant 0 : i32
    return %arg0, %c0_i32, %c0_i32_0 : i32, i32, i32
  }
  func.func @transform_2(%arg0: i32, %arg1: i32) -> (i32, i32, i32) {
    %c0_i32 = arith.constant 0 : i32
    %c0_i32_0 = arith.constant 0 : i32
    %c0_i32_1 = arith.constant 0 : i32
    return %arg1, %c0_i32, %c0_i32_0 : i32, i32, i32
  }
  func.func @transform_3(%arg0: i32, %arg1: i32) -> (i32, i32, i32) {
    %c0_i32 = arith.constant 0 : i32
    %c0_i32_0 = arith.constant 0 : i32
    %c0_i32_1 = arith.constant 0 : i32
    return %arg1, %c0_i32, %c0_i32_0 : i32, i32, i32
  }
  func.func @transform_4(%arg0: i32, %arg1: i32) -> (i32, i32) {
    %c0_i32 = arith.constant 0 : i32
    %c0_i32_0 = arith.constant 0 : i32
    %c0_i32_1 = arith.constant 0 : i32
    return %c0_i32, %c0_i32_0 : i32, i32
  }
  func.func @transform_5(%arg0: i32, %arg1: i32) -> (i32, i32) {
    %c0_i32 = arith.constant 0 : i32
    %c0_i32_0 = arith.constant 0 : i32
    %c0_i32_1 = arith.constant 0 : i32
    return %c0_i32, %c0_i32_0 : i32, i32
  }
  func.func @transform_6(%arg0: i32, %arg1: i32) -> (i32, i32) {
    %c0_i32 = arith.constant 0 : i32
    %c0_i32_0 = arith.constant 0 : i32
    %c0_i32_1 = arith.constant 0 : i32
    return %c0_i32, %c0_i32_0 : i32, i32
  }
  func.func @transform_7(%arg0: i32, %arg1: i32) -> (i32, i32, i32, i32) {
    %c0_i32 = arith.constant 0 : i32
    %c0_i32_0 = arith.constant 0 : i32
    %c0_i32_1 = arith.constant 0 : i32
    return %arg0, %arg1, %c0_i32, %c0_i32_0 : i32, i32, i32, i32
  }
}

</mosaic_0001>

<bundles_post_ra>
// kernel: tpu_custom_call.1
= control target key start
LH: loop header
LB: loop body
LE: loop exit
PB: predicated region body
PF: predicated region fallthrough
CT: control target
= control target key end

     0   :  { %s2406_s0 = inlined_call_operand.hbm [shape: f32[2,32,128], index: 0, kind: input, shape index: {}]   ;;  %s2407_s1 = inlined_call_operand.hbm [shape: f32[2,32,128], index: 1, kind: input, shape index: {}]   ;;  %s2408_s2 = inlined_call_operand.vmem [shape: bf16[1,32,1024], index: 2, kind: input, shape index: {}]   ;;  %s2409_s3 = inlined_call_operand.vmem [shape: bf16[1,32,1024], index: 3, kind: input, shape index: {}]   ;;  %s2410_s4 = inlined_call_operand.vmem [shape: f32[32,64], index: 4, kind: input, shape index: {}]   ;;  %s2411_s5 = inlined_call_operand.vmem [shape: f32[256,16], index: 5, kind: input, shape index: {}]   ;;  %s2412_s6 = inlined_call_operand.hbm [shape: f32[8,128], index: 6, kind: input, shape index: {}]   ;;  %s2413_s7 = inlined_call_operand.vmem [shape: f32[2,1,8,1], index: 7, kind: output, shape index: {}]  }
   0x1   :  { %2417 = sst [smem:[#allocation12_spill]] %s2406_s0 }
   0x2   :  { %2418 = sst [smem:[#allocation13_spill]] %s2412_s6 }
   0x3   :  { %2419 = sst [smem:[#allocation14_spill]] %s2413_s7 }
   0x4   :  { %12 = vsyncpa [#allocation3], 0 }
   0x5   :  { %14 = vsyncpa [#allocation3 + $0x1], 0 }
   0x6   :  { %15 = vsyncpa [#allocation5], 0 }
   0x7   :  { %17 = vsyncpa [#allocation5 + $0x1], 0  ;;  %s1678_s24 = smov 0   ;;  %s1680_s25 = smov 0  }
   0x8   :  { %s1682_s26 = smov 0   ;;  %s1684_s27 = smov 0  }
   0x9   :  { %s1686_s28 = smov 0   ;;  %s1688_s29 = smov 0  }
   0xa LB: > { %2420 = sst [smem:[#allocation10_spill]] %s1629_s28  ;;  %s2414_s30 = sadd.s32 4294967295, %s1633_s29   ;;  %s1633_s29 = sphi %s1688_s29, %s23_s29   ;;  %s1629_s28 = sphi %s1686_s28, %s2432_s28   ;;  %s1625_s27 = sphi %s1684_s27, %s2431_s27   ;;  %s1621_s26 = sphi %s1682_s26, %s2435_s26   ;;  %s1617_s25 = sphi %s1680_s25, %s2434_s25   ;;  %s1613_s24 = sphi %s1678_s24, %s2433_s24  }
   0xb   : > { %s42_s8 = sadd.s32 1, %s1621_s26  ;;  %p49_p0 = scmp.ne.s32.totalorder %s1621_s26, %s1617_s25 }
   0xc   : > { %p50_p1 = scmp.eq.s32.totalorder %s1633_s29, 0  ;;  %p55_p2 = scmp.ne.s32.totalorder %s1617_s25, %s1613_s24 }
   0xd   : > { %p1714_p3 = scmp.eq.s32.totalorder %s2414_s30, 0  ;;  %p1328_p5 = scmp.ge.s32.totalorder %s1633_s29, 1 }
   0xe   : > { %p1718_p4 = por %p50_p1, %p49_p0  ;;  %p235_p7 = scmp.lt.s32.totalorder %s1633_s29, 3 }
   0xf   : > { %p1725_p6 = por %p1714_p3, %p55_p2  ;;  %s2424_s6 = sld [smem:[#allocation13_spill]] }
  0x10   : > { %p1733_p8 = pnand %p1328_p5, %p235_p7  ;;  %s1635_s16 = smov [#allocation6]  }
  0x11   : > { %s271_s17 = sshll.u32 %s1635_s16, 4  ;;  %p1432_p10 = scmp.lt.s32.totalorder %s1633_s29, 2  ;;  %s272_s17 = int_to_ptr.vmem [resolvable:$true] %s271_s17 }
  0x12   : > { %p1420_p9 = pneg %p1733_p8  ;;  %s35_s19 = sadd.s32 1, %s1629_s28 }
  0x13   : > { %p1744_p12 = pnand %p1432_p10, %p1718_p4  ;;  %p37_p13 = scmp.ge.s32.totalorder %s35_s19, 2 }
  0x14   : > { %p1421_p11 = pnand %p1420_p9, %p1714_p3  ;;  %s282_s20 = sand.u32 1, %s1621_s26  }
  0x15   : > { %s269_s14 = sshll.u32 %s2424_s6, 4  ;;  %s1378_s21 = sshll.u32 %s1629_s28, 5  ;;  %s270_s14 = int_to_ptr.hbm [resolvable:$true] %s269_s14 }
  0x16   : > { %1423 = dma.hbm_to_vmem [thread:$0]  (!%p1421_p11), %s270_s14, 128, %s272_s17, [#allocation5]  }
  0x17   : > { %s2437_s19 = smov (%p37_p13, %s35_s19), 0  ;;  %s1333_s22 = sshll.u32 %s282_s20, 5 }
  0x18   : > { %2427 = sst [smem:[#allocation11_spill]] %s2437_s19  ;;  %s39_s23 = ssub.s32 %s1629_s28, %s2437_s19 }
  0x19   : > { %p40_p0 = scmp.eq.s32.totalorder %s39_s23, 0  ;;  %s2428_s0 = sld [smem:[#allocation12_spill]] }
  0x1a   : > { %s286_s16 = scalar_lea.vmem [#allocation2], %s1333_s22  ;;  %s283_s17 = scalar_lea.sflag [#allocation3], %s282_s20 }
  0x1b   : > { %s294_s30 = sshll.u32 %s286_s16, 4  ;;  %s1636_s6 = smov 128   ;;  %s295_s30 = int_to_ptr.vmem [resolvable:$true] %s294_s30 }
  0x1c   : > { %s1761_s14 = scalar_select %p40_p0, %s1621_s26, %s42_s8  }
  0x1d   : > { %s1637_s7 = smov 8   ;;  %s313_s24 = scalar_lea.hbm %s2407_s1, %s1378_s21 }
  0x1e   : > { %s314_s12 = sshll.u32 %s313_s24, 4  ;;  %s304_s16 = sand.u32 1, %s1633_s29   ;;  %s315_s12 = int_to_ptr.hbm [resolvable:$true] %s314_s12 }
  0x1f   : > { %s291_s10 = scalar_lea.hbm %s2428_s0, %s1378_s21  ;;  %s305_s28 = scalar_lea.sflag [#allocation5], %s304_s16 }
  0x20   : > { %s292_s13 = sshll.u32 %s291_s10, 4  ;;  %s308_s10 = scalar_lea.vmem [#allocation4], %s1333_s22  ;;  %s293_s13 = int_to_ptr.hbm [resolvable:$true] %s292_s13 }
  0x21   : > { %1427 = dma.hbm_to_vmem [thread:$0]  (!%p1744_p12), %s293_s13, 512, %s295_s30, %s283_s17, %s1636_s6, %s1636_s6, %s1637_s7  }
  0x22   : > { %s316_s0 = sshll.u32 %s308_s10, 4  ;;  %328 = sbr.rel (%p1733_p8) target bundleno = 721 (0x2d1), region = 48  ;;  %s317_s0 = int_to_ptr.vmem [resolvable:$true] %s316_s0 }
  0x23   : > { %1430 = dma.hbm_to_vmem [thread:$0]  (!%p1744_p12), %s315_s12, 512, %s317_s0, %s305_s28, %s1636_s6, %s1636_s6, %s1637_s7  }
  0x24   : > { %s330_s8 = sand.u32 (!%p1733_p8), 1, %s1617_s25  }
  0x25   : > { %s1340_s30 = sshll.u32 (!%p1733_p8), %s330_s8, 5  ;;  %s331_s20 = scalar_lea.sflag (!%p1733_p8), [#allocation3], %s330_s8 }
  0x26   : > { %s1774_s13 = scalar_lea.vmem (!%p1733_p8), [#allocation2], %s1340_s30 }
  0x27   : > { %1600 = dma.done.wait (%p1725_p6), %s331_s20, 512  }
  0x28   : > { %1602 = vsyncadd (%p1725_p6), %s331_s20, 4294966784  ;;  %s2429_s19 = sadd.s32 4294967295, %s1633_s29   ;;  %s344_s6 = scalar_lea.vmem [#allocation4], %s1340_s30 }
  0x29   : > { %s340_s18 = sand.u32 1, %s2429_s19  }
  0x2a   : > { %s341_s0 = scalar_lea.sflag [#allocation5], %s340_s18 }
  0x2b   : > { %1604 = dma.done.wait (%p1725_p6), %s341_s0, 512  }
  0x2c   : > { %1606 = vsyncadd (%p1725_p6), %s341_s0, 4294966784 }
  0x2d   : > { %1608 = dma.done.wait (%p1714_p3), [#allocation5], 128  }
  0x2e   : > { %1610 = vsyncadd (%p1714_p3), [#allocation5], 4294967168  ;;  %v1791_v0 = vld [vmem:[%s1774_s13 + $0x18] sm:$0xff]  ;;  %v1798_v2 = vld [vmem:[%s2408_s2 + $0x60] sm:$0xff]  ;;  %vm715_vm0 = vcmask 523264   ;;  %vm1175_vm1 = vcmask 130048  }
  0x2f   : > { %v1793_v1 = vld [vmem:[%s344_s6 + $0x18] sm:$0xff]  ;;  %v463_v3 = vunpack.c.l.bf16 %v1798_v2  ;;  %v1804_v4 = vld [vmem:[%s2409_s3 + $0x60] sm:$0xff]  ;;  %v1807_v5 = vld [vmem:[%s1774_s13 + $0x10] sm:$0xff]  ;;  %v464_v11 = vunpack.c.h.bf16 %v1798_v2  ;;  %p408_p1 = scmp.lt.s32.totalorder %s1625_s27, 1  ;;  %s2430_s8 = sld [smem:[#allocation14_spill]]  ;;  %vm1179_vm2 = vcmask 7168  }
  0x30   : > { %v1809_v6 = vld [vmem:[%s344_s6 + $0x10] sm:$0xff]  ;;  %v511_v7 = vunpack.c.l.bf16 %v1804_v4  ;;  %v1815_v8 = vld [vmem:[%s2408_s2 + $0x40] sm:$0xff]  ;;  %v1823_v10 = vld [vmem:[%s1774_s13 + $0x8] sm:$0xff]  ;;  %v512_v12 = vunpack.c.h.bf16 %v1804_v4 }
  0x31   : > { %v1820_v9 = vld [vmem:[%s2409_s3 + $0x40] sm:$0xff]  ;;  %v671_v13 = vmul.f32 %v463_v3, %v1793_v1  ;;  %v455_v14 = vunpack.c.l.bf16 %v1815_v8  ;;  %v1830_v16 = vld [vmem:[%s344_s6 + $0x8] sm:$0xff]  ;;  %v1843_v19 = vmul.f32 %v463_v3, %v1791_v0  ;;  %v672_v50 = vmul.f32 %v464_v11, %v1793_v1  ;;  %s2439_s27 = smov (!%p408_p1, %s1625_s27), 1 }
  0x32   : > { %v503_v15 = vunpack.c.l.bf16 %v1820_v9  ;;  %v1835_v17 = vld [vmem:[%s2408_s2 + $0x20] sm:$0xff]  ;;  %v639_v20 = vmul.f32 %v511_v7, %v1791_v0  ;;  %v575_v25 = vmul.f32 %v511_v7, %v1793_v1  ;;  %v640_v47 = vmul.f32 %v512_v12, %v1791_v0  ;;  %v1903_v56 = vld [vmem:[%s2408_s2 + $0x68] sm:$0xff]  ;;  %s1343_s12 = sshll.u32 %s2439_s27, 3 }
  0x33   : > { %v1840_v18 = vld [vmem:[%s2409_s3 + $0x20] sm:$0xff]  ;;  %v447_v21 = vunpack.c.l.bf16 %v1835_v17  ;;  %v663_v27 = vmul.f32 %v455_v14, %v1809_v6  ;;  %v1868_v31 = vmul.f32 %v455_v14, %v1807_v5  ;;  %v456_v51 = vunpack.c.h.bf16 %v1815_v8  ;;  %v1915_v3 = vld [vmem:[%s2409_s3 + $0x68] sm:$0xff] }
  0x34   : > { %v495_v22 = vunpack.c.l.bf16 %v1840_v18  ;;  %v1848_v23 = vld [vmem:[%s344_s6] sm:$0xff]  ;;  %v631_v26 = vmul.f32 %v503_v15, %v1807_v5  ;;  %v703_v32 = vadd.f32 %v671_v13, %v639_v20  ;;  %v607_v38 = vsub.f32 %v1843_v19, %v575_v25  ;;  %v1924_v13 = vld [vmem:[%s2408_s2 + $0x48] sm:$0xff] }
  0x35   : > { %v1853_v24 = vld [vmem:[%s2408_s2] sm:$0xff]  ;;  %v655_v34 = vmul.f32 %v447_v21, %v1830_v16  ;;  %v567_v39 = vmul.f32 %v503_v15, %v1809_v6  ;;  %v1878_v42 = vmul.f32 %v447_v21, %v1823_v10  ;;  %v504_v53 = vunpack.c.h.bf16 %v1820_v9  ;;  %s414_s30 = scalar_lea.vmem %s2430_s8, %s1343_s12 }
  0x36   : > { %v1859_v28 = vld [vmem:[%s1774_s13] sm:$0xff]  ;;  %v439_v29 = vunpack.c.l.bf16 %v1853_v24  ;;  %v623_v33 = vmul.f32 %v495_v22, %v1823_v10  ;;  %v695_v36 = vadd.f32 %v663_v27, %v631_v26  ;;  %736 = vmatpush.msra.mxu0 %v703_v32  ;;  %v1881_v43 = vmul.f32 %v495_v22, %v1830_v16  ;;  %v1938_v22 = vld [vmem:[%s2408_s2 + $0x28] sm:$0xff] }
  0x37   : > { %v1865_v30 = vld [vmem:[%s2409_s3] sm:$0xff]  ;;  %v599_v44 = vsub.f32 %v1868_v31, %v567_v39  ;;  %v448_v54 = vunpack.c.h.bf16 %v1835_v17  ;;  %v496_v55 = vunpack.c.h.bf16 %v1840_v18  ;;  %v704_v57 = vadd.f32 %v672_v50, %v640_v47  ;;  %v1931_v18 = vld [vmem:[%s2409_s3 + $0x48] sm:$0xff]  ;;  %v1991_v50 = vld [vmem:[%s2408_s2 + $0x50] sm:$0xff] }
  0x38   : > { %v487_v35 = vunpack.c.l.bf16 %v1865_v30  ;;  %v647_v37 = vmul.f32 %v439_v29, %v1848_v23  ;;  %v687_v40 = vadd.f32 %v655_v34, %v623_v33  ;;  %v1885_v45 = vmul.f32 %v439_v29, %v1859_v28  ;;  %737 = vmatpush.msra.mxu0 %v695_v36  ;;  %v1969_v36 = vld [vmem:[%s2408_s2 + $0x70] sm:$0xff] }
  0x39   : > { %v591_v49 = vsub.f32 %v1878_v42, %v1881_v43  ;;  %v664_v58 = vmul.f32 %v456_v51, %v1809_v6  ;;  %v440_v59 = vunpack.c.h.bf16 %v1853_v24  ;;  %v488_v60 = vunpack.c.h.bf16 %v1865_v30  ;;  %765 = vmatpush.msra.mxu1 %v704_v57  ;;  %v1943_v24 = vld [vmem:[%s2409_s3 + $0x28] sm:$0xff]  ;;  %v1982_v42 = vld [vmem:[%s2410_s4] sm:$0xff] }
  0x3a   : > { %v615_v41 = vmul.f32 %v487_v35, %v1859_v28  ;;  %v1888_v46 = vmul.f32 %v487_v35, %v1848_v23  ;;  %738 = vmatpush.msra.mxu0 %v687_v40  ;;  %v632_v61 = vmul.f32 %v504_v53, %v1807_v5  ;;  %v624_v62 = vmul.f32 %v496_v55, %v1823_v10  ;;  %v1951_v30 = vld [vmem:[%s2408_s2 + $0x8] sm:$0xff] }
  0x3b   : > { %v656_v63 = vmul.f32 %v448_v54, %v1830_v16  ;;  %v544_v2 = vmul.f32 %v464_v11, %v1791_v0  ;;  %v616_v4 = vmul.f32 %v488_v60, %v1859_v28  ;;  %v648_v7 = vmul.f32 %v440_v59, %v1848_v23  ;;  %v1964_v35 = vld [vmem:[%s2409_s3 + $0x8] sm:$0xff] }
  0x3c   : > { %v679_v48 = vadd.f32 %v647_v37, %v615_v41  ;;  %v583_v52 = vsub.f32 %v1885_v45, %v1888_v46  ;;  %v576_v8 = vmul.f32 %v512_v12, %v1793_v1  ;;  %v465_v9 = vunpack.c.l.bf16 %v1903_v56  ;;  %v1977_v41 = vld [vmem:[%s2409_s3 + $0x70] sm:$0xff] }
  0x3d   : > { %v696_v11 = vadd.f32 %v664_v58, %v632_v61  ;;  %v688_v14 = vadd.f32 %v656_v63, %v624_v62  ;;  %v536_v15 = vmul.f32 %v456_v51, %v1807_v5  ;;  %v568_v17 = vmul.f32 %v504_v53, %v1809_v6  ;;  %v2011_v61 = vld [vmem:[%s2408_s2 + $0x30] sm:$0xff] }
  0x3e   : > { %739 = vmatpush.msra.mxu0 %v679_v48  ;;  %v680_v12 = vadd.f32 %v648_v7, %v616_v4  ;;  %v608_v19 = vsub.f32 %v544_v2, %v576_v8  ;;  %v513_v20 = vunpack.c.l.bf16 %v1915_v3  ;;  %v673_v21 = vmul.f32 %v465_v9, %v1793_v1  ;;  %v2021_v63 = vld [vmem:[%s2409_s3 + $0x30] sm:$0xff] }
  0x3f   : > { %766 = vmatpush.msra.mxu1 %v696_v11  ;;  %v600_v25 = vsub.f32 %v536_v15, %v568_v17  ;;  %v528_v26 = vmul.f32 %v448_v54, %v1823_v10  ;;  %v560_v27 = vmul.f32 %v496_v55, %v1830_v16  ;;  %v457_v29 = vunpack.c.l.bf16 %v1924_v13  ;;  %v2000_v55 = vld [vmem:[%s2409_s3 + $0x50] sm:$0xff] }
  0x40   : > { %740 = vmatpush.msra.mxu0 %v607_v38  ;;  %v641_v31 = vmul.f32 %v513_v20, %v1791_v0  ;;  %v505_v32 = vunpack.c.l.bf16 %v1931_v18  ;;  %v1956_v33 = vmul.f32 %v440_v59, %v1859_v28  ;;  %v1959_v34 = vmul.f32 %v488_v60, %v1848_v23  ;;  %v2033_v17 = vld [vmem:[%s2408_s2 + $0x10] sm:$0xff] }
  0x41   : > { %767 = vmatpush.msra.mxu1 %v688_v14  ;;  %v592_v37 = vsub.f32 %v528_v26, %v560_v27  ;;  %v665_v38 = vmul.f32 %v457_v29, %v1809_v6  ;;  %v449_v39 = vunpack.c.l.bf16 %v1938_v22  ;;  %v497_v40 = vunpack.c.l.bf16 %v1943_v24 }
  0x42   : > { %741 = vmatpush.msra.mxu0 %v599_v44  ;;  %v705_v43 = vadd.f32 %v673_v21, %v641_v31  ;;  %v633_v44 = vmul.f32 %v505_v32, %v1807_v5  ;;  %v584_v47 = vsub.f32 %v1956_v33, %v1959_v34  ;;  %v441_v48 = vunpack.c.l.bf16 %v1951_v30 }
  0x43   : > { %768 = vmatpush.msra.mxu1 %v680_v12  ;;  %v657_v51 = vmul.f32 %v449_v39, %v1830_v16  ;;  %v489_v53 = vunpack.c.l.bf16 %v1964_v35  ;;  %v467_v54 = vunpack.c.l.bf16 %v1969_v36  ;;  %v515_v59 = vunpack.c.l.bf16 %v1977_v41  ;;  %v2038_v12 = vld [vmem:[%s2409_s3 + $0x10] sm:$0xff] }
  0x44   : > { %742 = vmatpush.msra.mxu0 %v591_v49  ;;  %v625_v49 = vmul.f32 %v497_v40, %v1823_v10  ;;  %794 = vmatpush.msra.mxu2 %v705_v43  ;;  %v697_v57 = vadd.f32 %v665_v38, %v633_v44  ;;  %v649_v58 = vmul.f32 %v441_v48, %v1848_v23  ;;  %v507_v7 = vunpack.c.l.bf16 %v2000_v55 }
  0x45   : > { %v545_v60 = vmul.f32 %v465_v9, %v1791_v0  ;;  %769 = vmatpush.msra.mxu1 %v608_v19  ;;  %v617_v45 = vmul.f32 %v489_v53, %v1859_v28  ;;  %v675_v46 = vmul.f32 %v467_v54, %v1793_v1  ;;  %v643_v2 = vmul.f32 %v515_v59, %v1791_v0 }
  0x46   : > { %743 = vmatpush.msra.mxu0 %v583_v52  ;;  %v689_v62 = vadd.f32 %v657_v51, %v625_v49  ;;  %v459_v52 = vunpack.c.l.bf16 %v1991_v50  ;;  %795 = vmatpush.msra.mxu2 %v697_v57  ;;  %v577_v4 = vmul.f32 %v513_v20, %v1793_v1  ;;  %v537_v8 = vmul.f32 %v457_v29, %v1807_v5 }
  0x47   : > { %1344 = vmatmul.msk.f32.vlgmr.msra.gmra.mxu0 %vm715_vm0, %v1982_v42  ;;  %770 = vmatpush.msra.mxu1 %v600_v25  ;;  %v681_v9 = vadd.f32 %v649_v58, %v617_v45  ;;  %v569_v14 = vmul.f32 %v505_v32, %v1809_v6  ;;  %v451_v15 = vunpack.c.l.bf16 %v2011_v61  ;;  %v707_v19 = vadd.f32 %v675_v46, %v643_v2  ;;  %v2048_v32 = vld [vmem:[%s2410_s4 + $0x8] sm:$0xff] }
  0x48   : > { %v667_v11 = vmul.f32 %v459_v52, %v1809_v6  ;;  %796 = vmatpush.msra.mxu2 %v689_v62  ;;  %v609_v20 = vsub.f32 %v545_v60, %v577_v4  ;;  %v635_v21 = vmul.f32 %v507_v7, %v1807_v5  ;;  %v499_v25 = vunpack.c.l.bf16 %v2021_v63 }
  0x49   : > { %771 = vmatpush.msra.mxu1 %v592_v37  ;;  %v601_v26 = vsub.f32 %v537_v8, %v569_v14  ;;  %v659_v27 = vmul.f32 %v451_v15, %v1830_v16  ;;  %v529_v29 = vmul.f32 %v449_v39, %v1823_v10  ;;  %v561_v31 = vmul.f32 %v497_v40, %v1830_v16 }
  0x4a   : > { %797 = vmatpush.msra.mxu2 %v681_v9  ;;  %852 = vmatpush.msrb.mxu0 %v707_v19  ;;  %v699_v33 = vadd.f32 %v667_v11, %v635_v21  ;;  %v627_v34 = vmul.f32 %v499_v25, %v1823_v10  ;;  %v443_v38 = vunpack.c.l.bf16 %v2033_v17  ;;  %v491_v37 = vunpack.c.l.bf16 %v2038_v12 }
  0x4b   : > { %772 = vmatpush.msra.mxu1 %v584_v47  ;;  %v593_v43 = vsub.f32 %v529_v29, %v561_v31  ;;  %v521_v39 = vmul.f32 %v441_v48, %v1859_v28  ;;  %v553_v40 = vmul.f32 %v489_v53, %v1848_v23  ;;  %v547_v44 = vmul.f32 %v467_v54, %v1791_v0 }
  0x4c   : > { %1348 = vmatmul.msk.f32.vlgmr.msra.gmra.mxu1 %vm715_vm0, %v1982_v42  ;;  %798 = vmatpush.msra.mxu2 %v609_v20  ;;  %v691_v49 = vadd.f32 %v659_v27, %v627_v34  ;;  %v619_v51 = vmul.f32 %v491_v37, %v1859_v28  ;;  %v651_v57 = vmul.f32 %v443_v38, %v1848_v23  ;;  %v466_v58 = vunpack.c.h.bf16 %v1903_v56 }
  0x4d   : > { %v585_v47 = vsub.f32 %v521_v39, %v553_v40  ;;  %v579_v48 = vmul.f32 %v515_v59, %v1793_v1  ;;  %v514_v53 = vunpack.c.h.bf16 %v1915_v3  ;;  %v539_v54 = vmul.f32 %v459_v52, %v1807_v5  ;;  %853 = vmatpush.msrb.mxu0 %v699_v33 }
  0x4e   : > { %799 = vmatpush.msra.mxu2 %v601_v26  ;;  %v683_v60 = vadd.f32 %v651_v57, %v619_v51  ;;  %v674_v62 = vmul.f32 %v466_v58, %v1793_v1  ;;  %v571_v45 = vmul.f32 %v507_v7, %v1809_v6  ;;  %v458_v46 = vunpack.c.h.bf16 %v1924_v13 }
  0x4f   : > { %1345 = vmatmul.msk.f32.gmra.mxu0 %vm715_vm0, %v2048_v32  ;;  %v611_v56 = vsub.f32 %v547_v44, %v579_v48  ;;  %v642_v2 = vmul.f32 %v514_v53, %v1791_v0  ;;  %v506_v4 = vunpack.c.h.bf16 %v1931_v18  ;;  %v531_v59 = vmul.f32 %v451_v15, %v1823_v10  ;;  %v2081_v18 = vld [vmem:[%s2410_s4 + $0x10] sm:$0xff] }
  0x50   : > { %854 = vmatpush.msrb.mxu0 %v691_v49  ;;  %800 = vmatpush.msra.mxu2 %v593_v43  ;;  %v603_v3 = vsub.f32 %v539_v54, %v571_v45  ;;  %v666_v52 = vmul.f32 %v458_v46, %v1809_v6  ;;  %v563_v8 = vmul.f32 %v499_v25, %v1830_v16  ;;  %v450_v9 = vunpack.c.h.bf16 %v1938_v22  ;;  %v2121_v54 = vld [vmem:[%s2410_s4 + $0x18] sm:$0xff] }
  0x51   : > { %v706_v11 = vadd.f32 %v674_v62, %v642_v2  ;;  %v634_v7 = vmul.f32 %v506_v4, %v1807_v5  ;;  %v498_v13 = vunpack.c.h.bf16 %v1943_v24  ;;  %v523_v14 = vmul.f32 %v443_v38, %v1859_v28 }
  0x52   : > { %855 = vmatpush.msrb.mxu0 %v683_v60  ;;  %801 = vmatpush.msra.mxu2 %v585_v47  ;;  %v595_v15 = vsub.f32 %v531_v59, %v563_v8  ;;  %v658_v19 = vmul.f32 %v450_v9, %v1830_v16  ;;  %v555_v20 = vmul.f32 %v491_v37, %v1848_v23  ;;  %v442_v22 = vunpack.c.h.bf16 %v1951_v30  ;;  %v2144_v8 = vld [vmem:[%s2408_s2 + $0x58] sm:$0xff] }
  0x53   : > { %1352 = vmatmul.msk.f32.vlgmr.msra.gmra.mxu2 %vm715_vm0, %v1982_v42  ;;  %823 = vmatpush.msra.mxu3 %v706_v11  ;;  %v698_v24 = vadd.f32 %v666_v52, %v634_v7  ;;  %v626_v21 = vmul.f32 %v498_v13, %v1823_v10  ;;  %v490_v25 = vunpack.c.h.bf16 %v1964_v35  ;;  %v468_v26 = vunpack.c.h.bf16 %v1969_v36 }
  0x54   : > { %1349 = vmatmul.msk.f32.gmra.mxu1 %vm715_vm0, %v2048_v32  ;;  %856 = vmatpush.msrb.mxu0 %v611_v56  ;;  %v587_v27 = vsub.f32 %v523_v14, %v555_v20  ;;  %v650_v29 = vmul.f32 %v442_v22, %v1848_v23  ;;  %v516_v30 = vunpack.c.h.bf16 %v1977_v41  ;;  %v546_v31 = vmul.f32 %v466_v58, %v1791_v0  ;;  %v2154_v14 = vld [vmem:[%s2409_s3 + $0x58] sm:$0xff] }
  0x55   : > { %824 = vmatpush.msra.mxu3 %v698_v24  ;;  %v690_v33 = vadd.f32 %v658_v19, %v626_v21  ;;  %v618_v35 = vmul.f32 %v490_v25, %v1859_v28  ;;  %v676_v36 = vmul.f32 %v468_v26, %v1793_v1  ;;  %v460_v34 = vunpack.c.h.bf16 %v1991_v50  ;;  %v2162_v24 = vld [vmem:[%s2408_s2 + $0x38] sm:$0xff] }
  0x56   : > { %857 = vmatpush.msrb.mxu0 %v603_v3  ;;  %v644_v38 = vmul.f32 %v516_v30, %v1791_v0  ;;  %v578_v37 = vmul.f32 %v514_v53, %v1793_v1  ;;  %v508_v41 = vunpack.c.h.bf16 %v2000_v55  ;;  %v538_v43 = vmul.f32 %v458_v46, %v1807_v5  ;;  %v2113_v55 = vld [vmem:[%s2408_s2 + $0x78] sm:$0xff] }
  0x57   : > { %1346 = vmatmul.msk.f32.gmra.mxu0 %vm715_vm0, %v2081_v18  ;;  %825 = vmatpush.msra.mxu3 %v690_v33  ;;  %v682_v39 = vadd.f32 %v650_v29, %v618_v35  ;;  %v668_v40 = vmul.f32 %v460_v34, %v1809_v6  ;;  %v570_v44 = vmul.f32 %v506_v4, %v1809_v6  ;;  %v452_v49 = vunpack.c.h.bf16 %v2011_v61  ;;  %v2129_v46 = vld [vmem:[%s2409_s3 + $0x78] sm:$0xff] }
  0x58   : > { %858 = vmatpush.msrb.mxu0 %v595_v15  ;;  %v708_v51 = vadd.f32 %v676_v36, %v644_v38  ;;  %v610_v50 = vsub.f32 %v546_v31, %v578_v37  ;;  %v636_v57 = vmul.f32 %v508_v41, %v1807_v5  ;;  %v500_v58 = vunpack.c.h.bf16 %v2021_v63  ;;  %v2170_v29 = vld [vmem:[%s2409_s3 + $0x38] sm:$0xff] }
  0x59   : > { %826 = vmatpush.msra.mxu3 %v682_v39  ;;  %v602_v47 = vsub.f32 %v538_v43, %v570_v44  ;;  %v660_v48 = vmul.f32 %v452_v49, %v1830_v16  ;;  %v530_v53 = vmul.f32 %v450_v9, %v1823_v10  ;;  %v562_v61 = vmul.f32 %v498_v13, %v1830_v16  ;;  %v2182_v36 = vld [vmem:[%s2409_s3 + $0x18] sm:$0xff] }
  0x5a   : > { %859 = vmatpush.msrb.mxu0 %v587_v27  ;;  %881 = vmatpush.msrb.mxu1 %v708_v51  ;;  %v700_v63 = vadd.f32 %v668_v40, %v636_v57  ;;  %v628_v60 = vmul.f32 %v500_v58, %v1823_v10  ;;  %v444_v62 = vunpack.c.h.bf16 %v2033_v17  ;;  %v492_v45 = vunpack.c.h.bf16 %v2038_v12 }
  0x5b   : > { %1353 = vmatmul.msk.f32.gmra.mxu2 %vm715_vm0, %v2048_v32  ;;  %827 = vmatpush.msra.mxu3 %v610_v50  ;;  %v594_v56 = vsub.f32 %v530_v53, %v562_v61  ;;  %v522_v2 = vmul.f32 %v442_v22, %v1859_v28  ;;  %v554_v4 = vmul.f32 %v490_v25, %v1848_v23  ;;  %v469_v59 = vunpack.c.l.bf16 %v2113_v55 }
  0x5c   : > { %1350 = vmatmul.msk.f32.gmra.mxu1 %vm715_vm0, %v2081_v18  ;;  %v692_v17 = vadd.f32 %v660_v48, %v628_v60  ;;  %v620_v12 = vmul.f32 %v492_v45, %v1859_v28  ;;  %v652_v3 = vmul.f32 %v444_v62, %v1848_v23  ;;  %v548_v52 = vmul.f32 %v468_v26, %v1791_v0 }
  0x5d   : > { %882 = vmatpush.msrb.mxu1 %v700_v63  ;;  %v586_v9 = vsub.f32 %v522_v2, %v554_v4  ;;  %v580_v11 = vmul.f32 %v516_v30, %v1793_v1  ;;  %v540_v7 = vmul.f32 %v460_v34, %v1807_v5  ;;  %v517_v13 = vunpack.c.l.bf16 %v2129_v46  ;;  %828 = vmatpush.msra.mxu3 %v602_v47  ;;  %v2175_v30 = vld [vmem:[%s2408_s2 + $0x18] sm:$0xff] }
  0x5e   : > { %v684_v15 = vadd.f32 %v652_v3, %v620_v12  ;;  %v572_v19 = vmul.f32 %v508_v41, %v1809_v6  ;;  %v677_v20 = vmul.f32 %v469_v59, %v1793_v1  ;;  %v532_v22 = vmul.f32 %v452_v49, %v1823_v10 }
  0x5f   : > { %1347 = vmatmul.msk.f32.gmra.mxu0 %vm715_vm0, %v2121_v54  ;;  %883 = vmatpush.msrb.mxu1 %v692_v17  ;;  %v612_v21 = vsub.f32 %v548_v52, %v580_v11  ;;  %v645_v25 = vmul.f32 %v517_v13, %v1791_v0  ;;  %v564_v26 = vmul.f32 %v500_v58, %v1830_v16  ;;  %v461_v27 = vunpack.c.l.bf16 %v2144_v8 }
  0x60   : > { %829 = vmatpush.msra.mxu3 %v594_v56  ;;  %v604_v31 = vsub.f32 %v540_v7, %v572_v19  ;;  %v509_v33 = vunpack.c.l.bf16 %v2154_v14  ;;  %v524_v35 = vmul.f32 %v444_v62, %v1859_v28  ;;  %v556_v37 = vmul.f32 %v492_v45, %v1848_v23 }
  0x61   : > { %884 = vmatpush.msrb.mxu1 %v684_v15  ;;  %v709_v34 = vadd.f32 %v677_v20, %v645_v25  ;;  %v669_v38 = vmul.f32 %v461_v27, %v1809_v6  ;;  %v453_v41 = vunpack.c.l.bf16 %v2162_v24  ;;  %v596_v43 = vsub.f32 %v532_v22, %v564_v26 }
  0x62   : > { %830 = vmatpush.msra.mxu3 %v586_v9  ;;  %v637_v39 = vmul.f32 %v509_v33, %v1807_v5  ;;  %v501_v40 = vunpack.c.l.bf16 %v2170_v29  ;;  %v445_v44 = vunpack.c.l.bf16 %v2175_v30  ;;  %v493_v51 = vunpack.c.l.bf16 %v2182_v36 }
  0x63   : > { %885 = vmatpush.msrb.mxu1 %v612_v21  ;;  %1354 = vmatmul.msk.f32.gmra.mxu2 %vm715_vm0, %v2081_v18  ;;  %v661_v49 = vmul.f32 %v453_v41, %v1830_v16  ;;  %v549_v50 = vmul.f32 %v469_v59, %v1791_v0  ;;  %v581_v57 = vmul.f32 %v517_v13, %v1793_v1  ;;  %v470_v53 = vunpack.c.h.bf16 %v2113_v55 }
  0x64   : > { %1351 = vmatmul.msk.f32.gmra.mxu1 %vm715_vm0, %v2121_v54  ;;  %1356 = vmatmul.msk.f32.vlgmr.msra.gmra.mxu3 %vm715_vm0, %v1982_v42  ;;  %v701_v58 = vadd.f32 %v669_v38, %v637_v39  ;;  %v629_v47 = vmul.f32 %v501_v40, %v1823_v10  ;;  %v653_v48 = vmul.f32 %v445_v44, %v1848_v23  ;;  %v518_v62 = vunpack.c.h.bf16 %v2129_v46 }
  0x65   : > { %886 = vmatpush.msrb.mxu1 %v604_v31  ;;  %v588_v61 = vsub.f32 %v524_v35, %v556_v37  ;;  %v621_v63 = vmul.f32 %v493_v51, %v1859_v28  ;;  %v541_v60 = vmul.f32 %v461_v27, %v1807_v5  ;;  %910 = vmatpush.msrb.mxu2 %v709_v34  ;;  %v462_v52 = vunpack.c.h.bf16 %v2144_v8 }
  0x66   : > { %v693_v45 = vadd.f32 %v661_v49, %v629_v47  ;;  %v613_v56 = vsub.f32 %v549_v50, %v581_v57  ;;  %v573_v2 = vmul.f32 %v509_v33, %v1809_v6  ;;  %v533_v55 = vmul.f32 %v453_v41, %v1823_v10  ;;  %v970_v49 = vld [vmem:[%s2411_s5 + $0x50] sm:$0xff]  ;;  %v969_v50 = vld [vmem:[%s2411_s5 + $0x48] sm:$0xff]  ;;  %v988_v57 = vld [vmem:[%s2411_s5 + $0xe0] sm:$0xff] }
  0x67   : > { %1360 = vmatmul.msk.f32.vlgmr.msrb.gmra.mxu0 %vm715_vm0, %v1982_v42  ;;  %887 = vmatpush.msrb.mxu1 %v596_v43  ;;  %v685_v4 = vadd.f32 %v653_v48, %v621_v63  ;;  %v565_v59 = vmul.f32 %v501_v40, %v1830_v16  ;;  %v646_v17 = vmul.f32 %v518_v62, %v1791_v0  ;;  %v510_v11 = vunpack.c.h.bf16 %v2154_v14  ;;  %v971_v40 = vld [vmem:[%s2411_s5 + $0x58] sm:$0xff]  ;;  %v986_v48 = vld [vmem:[%s2411_s5 + $0xd0] sm:$0xff]  ;;  %v965_v63 = vld [vmem:[%s2411_s5 + $0x28] sm:$0xff] }
  0x68   : > { %911 = vmatpush.msrb.mxu2 %v701_v58  ;;  %v525_v12 = vmul.f32 %v445_v44, %v1859_v28  ;;  %v557_v3 = vmul.f32 %v493_v51, %v1848_v23  ;;  %v678_v46 = vmul.f32 %v470_v53, %v1793_v1  ;;  %v605_v9 = vsub.f32 %v541_v60, %v573_v2  ;;  %v990_v44 = vld [vmem:[%s2411_s5 + $0xf0] sm:$0xff]  ;;  %v989_v51 = vld [vmem:[%s2411_s5 + $0xe8] sm:$0xff]  ;;  %v968_v58 = vld [vmem:[%s2411_s5 + $0x40] sm:$0xff] }
  0x69   : > { %888 = vmatpush.msrb.mxu1 %v588_v61  ;;  %v454_v7 = vunpack.c.h.bf16 %v2162_v24  ;;  %v502_v13 = vunpack.c.h.bf16 %v2170_v29  ;;  %v670_v19 = vmul.f32 %v462_v52, %v1809_v6  ;;  %v446_v20 = vunpack.c.h.bf16 %v2175_v30  ;;  %v987_v47 = vld [vmem:[%s2411_s5 + $0xd8] sm:$0xff]  ;;  %v985_v61 = vld [vmem:[%s2411_s5 + $0xc8] sm:$0xff]  ;;  %v964_v60 = vld [vmem:[%s2411_s5 + $0x20] sm:$0xff] }
  0x6a   : > { %912 = vmatpush.msrb.mxu2 %v693_v45  ;;  %v710_v15 = vadd.f32 %v678_v46, %v646_v17  ;;  %v494_v22 = vunpack.c.h.bf16 %v2182_v36  ;;  %v638_v8 = vmul.f32 %v510_v11, %v1807_v5  ;;  %v550_v24 = vmul.f32 %v470_v53, %v1791_v0  ;;  %v966_v53 = vld [vmem:[%s2411_s5 + $0x30] sm:$0xff]  ;;  %v961_v45 = vld [vmem:[%s2411_s5 + $0x8] sm:$0xff]  ;;  %v984_v2 = vld [vmem:[%s2411_s5 + $0xc0] sm:$0xff] }
  0x6b   : > { %1355 = vmatmul.msk.f32.gmra.mxu2 %vm715_vm0, %v2121_v54  ;;  %v630_v21 = vmul.f32 %v502_v13, %v1823_v10  ;;  %v662_v14 = vmul.f32 %v454_v7, %v1830_v16  ;;  %v597_v25 = vsub.f32 %v533_v55, %v565_v59  ;;  %v582_v27 = vmul.f32 %v518_v62, %v1793_v1  ;;  %v963_v62 = vld [vmem:[%s2411_s5 + $0x18] sm:$0xff]  ;;  %v980_v55 = vld [vmem:[%s2411_s5 + $0xa0] sm:$0xff]  ;;  %v978_v17 = vld [vmem:[%s2411_s5 + $0x90] sm:$0xff] }
  0x6c   : > { %1364 = vmatmul.msk.f32.vlgmr.msrb.gmra.mxu1 %vm715_vm0, %v1982_v42  ;;  %913 = vmatpush.msrb.mxu2 %v685_v4  ;;  %v622_v26 = vmul.f32 %v494_v22, %v1859_v28  ;;  %v702_v29 = vadd.f32 %v670_v19, %v638_v8  ;;  %v654_v30 = vmul.f32 %v446_v20, %v1848_v23  ;;  %v981_v4 = vld [vmem:[%s2411_s5 + $0xa8] sm:$0xff]  ;;  %v979_v59 = vld [vmem:[%s2411_s5 + $0x98] sm:$0xff] }
  0x6d   : > { %1357 = vmatmul.msk.f32.gmra.mxu3 %vm715_vm0, %v2048_v32  ;;  %v542_v0 = vmul.f32 %v462_v52, %v1807_v5  ;;  %v694_v31 = vadd.f32 %v662_v14, %v630_v21  ;;  %v614_v33 = vsub.f32 %v550_v24, %v582_v27  ;;  %v574_v35 = vmul.f32 %v510_v11, %v1809_v6  ;;  %v975_v6 = vld [vmem:[%s2411_s5 + $0x78] sm:$0xff] }
  0x6e   : > { %914 = vmatpush.msrb.mxu2 %v613_v56  ;;  %939 = vmatpush.msrb.mxu3 %v710_v15  ;;  %v534_v36 = vmul.f32 %v454_v7, %v1823_v10  ;;  %v566_v1 = vmul.f32 %v502_v13, %v1830_v16  ;;  %v526_v34 = vmul.f32 %v446_v20, %v1859_v28  ;;  %v974_v10 = vld [vmem:[%s2411_s5 + $0x70] sm:$0xff]  ;;  %v973_v16 = vld [vmem:[%s2411_s5 + $0x68] sm:$0xff]  ;;  %v991_v28 = vld [vmem:[%s2411_s5 + $0xf8] sm:$0xff] }
  0x6f   : > { %1361 = vmatmul.msk.f32.gmra.mxu0 %vm715_vm0, %v2048_v32  ;;  %v558_v38 = vmul.f32 %v494_v22, %v1848_v23  ;;  %v589_v37 = vsub.f32 %v525_v12, %v557_v3  ;;  %v606_v41 = vsub.f32 %v542_v0, %v574_v35  ;;  %v686_v39 = vadd.f32 %v654_v30, %v622_v26  ;;  %v972_v23 = vld [vmem:[%s2411_s5 + $0x60] sm:$0xff]  ;;  %v977_v12 = vld [vmem:[%s2411_s5 + $0x88] sm:$0xff] }
  0x70   : > { %915 = vmatpush.msrb.mxu2 %v605_v9  ;;  %940 = vmatpush.msrb.mxu3 %v702_v29  ;;  %v598_v43 = vsub.f32 %v534_v36, %v566_v1  ;;  %v960_v56 = vld [vmem:[%s2411_s5] sm:$0xff] }
  0x71   : > { %v590_v5 = vsub.f32 %v526_v34, %v558_v38  ;;  %992 = vmatpush.msra.mxu0 %v975_v6  ;;  %1057 = vmatpush.msra.mxu1 %v991_v28  ;;  %v976_v3 = vld [vmem:[%s2411_s5 + $0x80] sm:$0xff] }
  0x72   : > { %916 = vmatpush.msrb.mxu2 %v597_v25  ;;  %941 = vmatpush.msrb.mxu3 %v694_v31 }
  0x73   : > { %993 = vmatpush.msra.mxu0 %v974_v10  ;;  %1058 = vmatpush.msra.mxu1 %v990_v44 }
  0x74   : > { %1365 = vmatmul.msk.f32.gmra.mxu1 %vm715_vm0, %v2048_v32  ;;  %917 = vmatpush.msrb.mxu2 %v589_v37 }
  0x75   : > { %1358 = vmatmul.msk.f32.gmra.mxu3 %vm715_vm0, %v2081_v18  ;;  %1368 = vmatmul.msk.f32.vlgmr.msrb.gmra.mxu2 %vm715_vm0, %v1982_v42 }
  0x76   : > { %942 = vmatpush.msrb.mxu3 %v686_v39  ;;  %994 = vmatpush.msra.mxu0 %v973_v16 }
  0x77   : > { %1362 = vmatmul.msk.f32.gmra.mxu0 %vm715_vm0, %v2081_v18  ;;  %1396 = vmatpush.msra.mxu2 %v991_v28 }
  0x78   : > { %943 = vmatpush.msrb.mxu3 %v614_v33  ;;  %995 = vmatpush.msra.mxu0 %v972_v23 }
  0x79   : > { %1397 = vmatpush.msra.mxu2 %v990_v44  ;;  %1059 = vmatpush.msra.mxu1 %v989_v51 }
  0x7a   : > { %944 = vmatpush.msrb.mxu3 %v606_v41  ;;  %996 = vmatpush.msra.mxu0 %v971_v40 }
  0x7b   : > { %1398 = vmatpush.msra.mxu2 %v989_v51  ;;  %1060 = vmatpush.msra.mxu1 %v988_v57 }
  0x7c   : > { %1366 = vmatmul.msk.f32.gmra.mxu1 %vm715_vm0, %v2081_v18  ;;  %945 = vmatpush.msrb.mxu3 %v598_v43 }
  0x7d   : > { %1359 = vmatmul.msk.f32.gmra.mxu3 %vm715_vm0, %v2121_v54  ;;  %1369 = vmatmul.msk.f32.gmra.mxu2 %vm715_vm0, %v2048_v32 }
  0x7e   : > { %946 = vmatpush.msrb.mxu3 %v590_v5  ;;  %997 = vmatpush.msra.mxu0 %v970_v49 }
  0x7f   : > { %1363 = vmatmul.msk.f32.gmra.mxu0 %vm715_vm0, %v2121_v54  ;;  %1399 = vmatpush.msra.mxu2 %v988_v57 }
  0x80   : > { %1380 = vmatpush.msra.mxu3 %v975_v6  ;;  %998 = vmatpush.msra.mxu0 %v969_v50 }
  0x81   : > { %1061 = vmatpush.msra.mxu1 %v987_v47  ;;  %1400 = vmatpush.msra.mxu2 %v987_v47 }
  0x82   : > { %1381 = vmatpush.msra.mxu3 %v974_v10  ;;  %999 = vmatpush.msra.mxu0 %v968_v58 }
  0x83   : > { %1062 = vmatpush.msra.mxu1 %v986_v48  ;;  %1401 = vmatpush.msra.mxu2 %v986_v48 }
  0x84   : > { %1382 = vmatpush.msra.mxu3 %v973_v16  ;;  %1367 = vmatmul.msk.f32.gmra.mxu1 %vm715_vm0, %v2121_v54 }
  0x85   : > { %1372 = vmatmul.msk.f32.vlgmr.msrb.gmra.mxu3 %vm715_vm0, %v1982_v42  ;;  %1370 = vmatmul.msk.f32.gmra.mxu2 %vm715_vm0, %v2081_v18  ;;  %v967_v42 = vld [vmem:[%s2411_s5 + $0x38] sm:$0xff] }
  0x86   : > { %1383 = vmatpush.msra.mxu3 %v972_v23  ;;  %1000 = vmatpush.msra.mxu0 %v967_v42 }
  0x87   : > { %1063 = vmatpush.msra.mxu1 %v985_v61  ;;  %1402 = vmatpush.msra.mxu2 %v985_v61 }
  0x88   : > { %1384 = vmatpush.msra.mxu3 %v971_v40  ;;  %1001 = vmatpush.msra.mxu0 %v966_v53 }
  0x89   : > { %1064 = vmatpush.msra.mxu1 %v984_v2  ;;  %1403 = vmatpush.msra.mxu2 %v984_v2 }
  0x8a   : > { %1385 = vmatpush.msra.mxu3 %v970_v49  ;;  %1002 = vmatpush.msra.mxu0 %v965_v63 }
  0x8c   : > { %1386 = vmatpush.msra.mxu3 %v969_v50  ;;  %1003 = vmatpush.msra.mxu0 %v964_v60 }
  0x8d   : > { %1373 = vmatmul.msk.f32.gmra.mxu3 %vm715_vm0, %v2048_v32  ;;  %1371 = vmatmul.msk.f32.gmra.mxu2 %vm715_vm0, %v2121_v54  ;;  %v962_v32 = vld [vmem:[%s2411_s5 + $0x10] sm:$0xff] }
  0x8e   : > { %1387 = vmatpush.msra.mxu3 %v968_v58  ;;  %1004 = vmatpush.msra.mxu0 %v963_v62 }
  0x90   : > { %1388 = vmatpush.msra.mxu3 %v967_v42  ;;  %1005 = vmatpush.msra.mxu0 %v962_v32 }
  0x92   : > { %1389 = vmatpush.msra.mxu3 %v966_v53  ;;  %1006 = vmatpush.msra.mxu0 %v961_v45 }
  0x94   : > { %1390 = vmatpush.msra.mxu3 %v965_v63  ;;  %1007 = vmatpush.msra.mxu0 %v960_v56 }
  0x95   : > { %1374 = vmatmul.msk.f32.gmra.mxu3 %vm715_vm0, %v2081_v18  ;;  %v983_v18 = vld [vmem:[%s2411_s5 + $0xb8] sm:$0xff] }
  0x96   : > { %1391 = vmatpush.msra.mxu3 %v964_v60  ;;  %1065 = vmatpush.msra.mxu1 %v983_v18 }
  0x97   : > { %1404 = vmatpush.msra.mxu2 %v983_v18 }
  0x98   : > { %1392 = vmatpush.msra.mxu3 %v963_v62 }
  0x9a   : > { %1393 = vmatpush.msra.mxu3 %v962_v32 }
  0x9c   : > { %1394 = vmatpush.msra.mxu3 %v961_v45 }
  0x9d   : > { %1375 = vmatmul.msk.f32.gmra.mxu3 %vm715_vm0, %v2121_v54  ;;  %v982_v54 = vld [vmem:[%s2411_s5 + $0xb0] sm:$0xff] }
  0x9e   : > { %1395 = vmatpush.msra.mxu3 %v960_v56  ;;  %1066 = vmatpush.msra.mxu1 %v982_v54 }
  0x9f   : > { %1405 = vmatpush.msra.mxu2 %v982_v54 }
  0xa0   : > { %1067 = vmatpush.msra.mxu1 %v981_v4 }
  0xa1   : > { %1406 = vmatpush.msra.mxu2 %v981_v4 }
  0xa2   : > { %1068 = vmatpush.msra.mxu1 %v980_v55 }
  0xa3   : > { %1407 = vmatpush.msra.mxu2 %v980_v55 }
  0xa4   : > { %1069 = vmatpush.msra.mxu1 %v979_v59 }
  0xa5   : > { %1408 = vmatpush.msra.mxu2 %v979_v59 }
  0xa6   : > { %1070 = vmatpush.msra.mxu1 %v978_v17 }
  0xa7   : > { %1409 = vmatpush.msra.mxu2 %v978_v17 }
  0xa8   : > { %1071 = vmatpush.msra.mxu1 %v977_v12 }
  0xa9   : > { %1410 = vmatpush.msra.mxu2 %v977_v12 }
  0xaa   : > { %1072 = vmatpush.msra.mxu1 %v976_v3 }
  0xab   : > { %1411 = vmatpush.msra.mxu2 %v976_v3 }
  0xc4   : > { %v745_v46 = vpop.f32.mrf.mxu0 }
  0xc5   : > { %1008 = vmatmul.f32.vlgmr.msra.gmra.mxu0 %v745_v46 }
  0xc9   : > { %v774_v52 = vpop.f32.mrf.mxu1 }
  0xcc   : > { %v748_v9 = vpop.f32.mrf.mxu0 }
  0xcd   : > { %1011 = vmatmul.f32.gmra.mxu0 %v748_v9 }
  0xd1   : > { %v777_v11 = vpop.f32.mrf.mxu1 }
  0xd4   : > { %v751_v7 = vpop.f32.mrf.mxu0 }
  0xd5   : > { %1014 = vmatmul.f32.gmra.mxu0 %v774_v52  ;;  %1073 = vmatmul.f32.vlgmr.msra.gmra.mxu1 %v751_v7 }
  0xd6   : > { %v803_v13 = vpop.f32.mrf.mxu2 }
  0xd9   : > { %v780_v15 = vpop.f32.mrf.mxu1 }
  0xdc   : > { %v754_v19 = vpop.f32.mrf.mxu0 }
  0xdd   : > { %1017 = vmatmul.f32.gmra.mxu0 %v777_v11  ;;  %1076 = vmatmul.f32.gmra.mxu1 %v754_v19 }
  0xde   : > { %v806_v20 = vpop.f32.mrf.mxu2 }
  0xe1   : > { %v783_v22 = vpop.f32.mrf.mxu1 }
  0xe4   : > { %v861_v8 = vpop.f32.mrf.mxu0 }
  0xe5   : > { %1020 = vmatmul.f32.gmra.mxu0 %v803_v13  ;;  %1079 = vmatmul.f32.gmra.mxu1 %v780_v15 }
  0xe6   : > { %v809_v21 = vpop.f32.mrf.mxu2 }
  0xe7   : > { %v832_v14 = vpop.f32.mrf.mxu3 }
  0xe9   : > { %v890_v25 = vpop.f32.mrf.mxu1 }
  0xec   : > { %v864_v24 = vpop.f32.mrf.mxu0 }
  0xed   : > { %1023 = vmatmul.f32.gmra.mxu0 %v806_v20  ;;  %1035 = vmatmul.f32.vlgmr.msra.gmra.mxu3 %v864_v24 }
  0xee   : > { %1082 = vmatmul.f32.gmra.mxu1 %v783_v22  ;;  %v812_v27 = vpop.f32.mrf.mxu2 }
  0xf0   : > { %v835_v26 = vpop.f32.mrf.mxu3 }
  0xf1   : > { %v893_v30 = vpop.f32.mrf.mxu1 }
  0xf4   : > { %v867_v29 = vpop.f32.mrf.mxu0 }
  0xf5   : > { %1026 = vmatmul.f32.gmra.mxu0 %v832_v14  ;;  %1038 = vmatmul.f32.gmra.mxu3 %v890_v25 }
  0xf6   : > { %1085 = vmatmul.f32.gmra.mxu1 %v809_v21 }
  0xf8   : > { %v838_v0 = vpop.f32.mrf.mxu3  ;;  %v919_v33 = vpop.f32.mrf.mxu2 }
  0xf9   : > { %v896_v35 = vpop.f32.mrf.mxu1 }
  0xfc   : > { %v870_v31 = vpop.f32.mrf.mxu0 }
  0xfd   : > { %1029 = vmatmul.f32.gmra.mxu0 %v835_v26  ;;  %1041 = vmatmul.f32.gmra.mxu3 %v893_v30 }
  0xfe   : > { %1088 = vmatmul.f32.gmra.mxu1 %v812_v27  ;;  %1100 = vmatmul.f32.vlgmr.msra.gmra.mxu2 %v870_v31 }
 0x100   : > { %v841_v36 = vpop.f32.mrf.mxu3  ;;  %v922_v1 = vpop.f32.mrf.mxu2 }
 0x101   : > { %v899_v34 = vpop.f32.mrf.mxu1 }
 0x105   : > { %1032 = vmatmul.f32.gmra.mxu0 %v861_v8  ;;  %1044 = vmatmul.f32.gmra.mxu3 %v919_v33 }
 0x106   : > { %1091 = vmatmul.f32.gmra.mxu1 %v838_v0  ;;  %1103 = vmatmul.f32.gmra.mxu2 %v896_v35 }
 0x108   : > { %v948_v38 = vpop.f32.mrf.mxu3  ;;  %v925_v37 = vpop.f32.mrf.mxu2 }
 0x10d   : > { %1047 = vmatmul.f32.gmra.mxu3 %v922_v1 }
 0x10e   : > { %1094 = vmatmul.f32.gmra.mxu1 %v841_v36  ;;  %1106 = vmatmul.f32.gmra.mxu2 %v899_v34 }
 0x110   : > { %v951_v41 = vpop.f32.mrf.mxu3  ;;  %v928_v43 = vpop.f32.mrf.mxu2 }
 0x115   : > { %1050 = vmatmul.f32.gmra.mxu3 %v948_v38 }
 0x116   : > { %1097 = vmatmul.f32.gmra.mxu1 %v867_v29  ;;  %1109 = vmatmul.f32.gmra.mxu2 %v925_v37 }
 0x118   : > { %v954_v5 = vpop.f32.mrf.mxu3 }
 0x11d   : > { %1053 = vmatmul.f32.gmra.mxu3 %v951_v41 }
 0x11e   : > { %1112 = vmatmul.f32.gmra.mxu2 %v928_v43 }
 0x120   : > { %v957_v39 = vpop.f32.mrf.mxu3 }
 0x126   : > { %1115 = vmatmul.f32.gmra.mxu2 %v954_v5 }
 0x12e   : > { %1118 = vmatmul.f32.gmra.mxu2 %v957_v39 }
 0x142   : > { %v1009_v6 = vpop.f32.mrf.mxu0 }
 0x14a   : > { %v1012_v23 = vpop.f32.mrf.mxu0 }
 0x152   : > { %v1074_v10 = vpop.f32.mrf.mxu1  ;;  %v2375_v51 = vpop.f32.mrf.mxu0 }
 0x153   : > { %v2369_v16 = vadd.f32 %v1074_v10, %v1009_v6 }
 0x15a   : > { %v1077_v28 = vpop.f32.mrf.mxu1  ;;  %v1018_v47 = vpop.f32.mrf.mxu0 }
 0x15b   : > { %v2371_v40 = vadd.f32 %v1077_v28, %v1012_v23 }
 0x162   : > { %v2373_v49 = vpop.f32.mrf.mxu1  ;;  %v1021_v63 = vpop.f32.mrf.mxu0 }
 0x163   : > { %v1081_v28 = vadd.f32 %v2373_v49, %v2375_v51 }
 0x16a   : > { %v1024_v45 = vpop.f32.mrf.mxu0 }
 0x16b   : > { %v1083_v58 = vpop.f32.mrf.mxu1 }
 0x16c   : > { %v1084_v6 = vadd.f32 %v1083_v58, %v1018_v47  ;;  %v1122_v58 = vmul.f32 %v2369_v16, %v2369_v16 }
 0x16e   : > { %v1138_v47 = vmax.f32 %v1122_v58, 1e-08 }
 0x170   : > { %v1036_v44 = vpop.f32.mrf.mxu3 }
 0x172   : > { %v1027_v54 = vpop.f32.mrf.mxu0 }
 0x173   : > { %v1086_v53 = vpop.f32.mrf.mxu1 }
 0x174   : > { %v1087_v43 = vadd.f32 %v1086_v53, %v1021_v63  ;;  %v1123_v53 = vmul.f32 %v2371_v40, %v2371_v40 }
 0x176   : > { %v1139_v51 = vmax.f32 %v1123_v53, 1e-08 }
 0x178   : > { %v1039_v50 = vpop.f32.mrf.mxu3 }
 0x17a   : > { %v1030_v17 = vpop.f32.mrf.mxu0 }
 0x17b   : > { %v1089_v32 = vpop.f32.mrf.mxu1 }
 0x17c   : > { %v1090_v38 = vadd.f32 %v1089_v32, %v1024_v45 }
 0x17e   : > { %v1127_v10 = vmul.f32 %v1090_v38, %v1090_v38 }
 0x180   : > { %v1042_v42 = vpop.f32.mrf.mxu3 }
 0x181   : > { %v1101_v57 = vpop.f32.mrf.mxu2 }
 0x182   : > { %v1102_v24 = vadd.f32 %v1101_v57, %v1036_v44  ;;  %v1033_v27 = vpop.f32.mrf.mxu0  ;;  %v1126_v44 = vmul.f32 %v1087_v43, %v1087_v43  ;;  %v1125_v57 = vmul.f32 %v1084_v6, %v1084_v6 }
 0x183   : > { %v1092_v18 = vpop.f32.mrf.mxu1 }
 0x184   : > { %v1131_v31 = vmul.f32 %v1102_v24, %v1102_v24  ;;  %v1093_v36 = vadd.f32 %v1092_v18, %v1027_v54  ;;  %v1141_v63 = vmax.f32 %v1125_v57, 1e-08 }
 0x186   : > { %v1147_v37 = vmax.f32 %v1131_v31, 1e-08  ;;  %v1128_v5 = vmul.f32 %v1093_v36, %v1093_v36 }
 0x188   : > { %v1045_v60 = vpop.f32.mrf.mxu3 }
 0x189   : > { %v1104_v48 = vpop.f32.mrf.mxu2 }
 0x18a   : > { %v1105_v22 = vadd.f32 %v1104_v48, %v1039_v50  ;;  %v1144_v50 = vmax.f32 %v1128_v5, 1e-08  ;;  %v1124_v48 = vmul.f32 %v1081_v28, %v1081_v28 }
 0x18b   : > { %v1095_v59 = vpop.f32.mrf.mxu1 }
 0x18c   : > { %v1132_v29 = vmul.f32 %v1105_v22, %v1105_v22  ;;  %v1096_v33 = vadd.f32 %v1095_v59, %v1030_v17  ;;  %v1140_v49 = vmax.f32 %v1124_v48, 1e-08 }
 0x18e   : > { %v1148_v1 = vmax.f32 %v1132_v29, 1e-08  ;;  %v1129_v41 = vmul.f32 %v1096_v33, %v1096_v33 }
 0x190   : > { %v1048_v56 = vpop.f32.mrf.mxu3  ;;  %v1145_v23 = vmax.f32 %v1129_v41, 1e-08 }
 0x191   : > { %v1107_v61 = vpop.f32.mrf.mxu2 }
 0x192   : > { %v1108_v15 = vadd.f32 %v1107_v61, %v1042_v42  ;;  %v1143_v42 = vmax.f32 %v1127_v10, 1e-08  ;;  %v1142_v61 = vmax.f32 %v1126_v44, 1e-08 }
 0x193   : > { %v1098_v14 = vpop.f32.mrf.mxu1 }
 0x194   : > { %v1133_v25 = vmul.f32 %v1108_v15, %v1108_v15  ;;  %v1099_v30 = vadd.f32 %v1098_v14, %v1033_v27 }
 0x196   : > { %v1149_v35 = vmax.f32 %v1133_v25, 1e-08  ;;  %v1130_v34 = vmul.f32 %v1099_v30, %v1099_v30 }
 0x198   : > { %v1051_v4 = vpop.f32.mrf.mxu3  ;;  %v1146_v39 = vmax.f32 %v1130_v34, 1e-08 }
 0x199   : > { %v1110_v62 = vpop.f32.mrf.mxu2 }
 0x19a   : > { %v1111_v11 = vadd.f32 %v1110_v62, %v1045_v60  ;;  %v1154_v60 = vld [vmem:[#allocation6] sm:$0xff] }
 0x19c   : > { %v1134_v8 = vmul.f32 %v1111_v11, %v1111_v11 }
 0x19e   : > { %v1150_v0 = vmax.f32 %v1134_v8, 1e-08 }
 0x1a0   : > { %v1054_v3 = vpop.f32.mrf.mxu3 }
 0x1a1   : > { %v1113_v2 = vpop.f32.mrf.mxu2 }
 0x1a2   : > { %v1114_v52 = vadd.f32 %v1113_v2, %v1048_v56 }
 0x1a4   : > { %v1135_v19 = vmul.f32 %v1114_v52, %v1114_v52 }
 0x1a6   : > { %v1151_v26 = vmax.f32 %v1135_v19, 1e-08 }
 0x1a9   : > { %v1116_v55 = vpop.f32.mrf.mxu2 }
 0x1aa   : > { %v1117_v12 = vadd.f32 %v1116_v55, %v1051_v4 }
 0x1ac   : > { %v1136_v7 = vmul.f32 %v1117_v12, %v1117_v12 }
 0x1ae   : > { %v1152_v21 = vmax.f32 %v1136_v7, 1e-08 }
 0x1b1   : > { %v1119_v46 = vpop.f32.mrf.mxu2 }
 0x1b2   : > { %v1120_v9 = vadd.f32 %v1119_v46, %v1054_v3 }
 0x1b4   : > { %v1137_v13 = vmul.f32 %v1120_v9, %v1120_v9 }
 0x1b6   : > { %v1153_v20 = vmax.f32 %v1137_v13, 1e-08 }
 0x1b8   : > { %1155 = vmatpush.msrb.mxu2 %v1153_v20 }
 0x1ba   : > { %1156 = vmatpush.msrb.mxu2 %v1152_v21 }
 0x1bc   : > { %1157 = vmatpush.msrb.mxu2 %v1151_v26 }
 0x1be   : > { %1158 = vmatpush.msrb.mxu2 %v1150_v0 }
 0x1c0   : > { %1159 = vmatpush.msrb.mxu2 %v1149_v35 }
 0x1c2   : > { %1160 = vmatpush.msrb.mxu2 %v1148_v1 }
 0x1c4   : > { %1161 = vmatpush.msrb.mxu2 %v1147_v37 }
 0x1c6   : > { %1162 = vmatpush.msrb.mxu2 %v1146_v39 }
 0x1c8   : > { %1163 = vmatpush.msrb.mxu2 %v1145_v23 }
 0x1ca   : > { %1164 = vmatpush.msrb.mxu2 %v1144_v50 }
 0x1cc   : > { %1165 = vmatpush.msrb.mxu2 %v1143_v42 }
 0x1ce   : > { %1166 = vmatpush.msrb.mxu2 %v1142_v61 }
 0x1d0   : > { %1167 = vmatpush.msrb.mxu2 %v1141_v63 }
 0x1d2   : > { %1168 = vmatpush.msrb.mxu2 %v1140_v49 }
 0x1d4   : > { %1169 = vmatpush.msrb.mxu2 %v1139_v51 }
 0x1d6   : > { %1170 = vmatpush.msrb.mxu2 %v1138_v47 }
 0x1d7   : > { %1171 = vmatmul.f32.vlgmr.msrb.gmra.mxu2 %v1154_v60 }
 0x25a   : > { %v1172_v62 = vpop.f32.mrf.mxu2 }
 0x25b   : > { %v1176_v32 = vsel %vm1175_vm1, %v1172_v62, 0.0 }
 0x25c   : > { %1177 = vadd.xlane.f32.xlu0 %v1176_v32 }
 0x2cf   : > { %v1178_v16 = vpop.xlane.xlu0 %1177 }
 0x2d0   : > { %1180 = vst.msk [vmem:[%s414_s30] sm:$0xff] %vm1179_vm2, %v1178_v16 }
 0x2d1 PF: > { %s23_s29 = sadd.s32 1, %s1633_s29   ;;  %s2431_s27 = sld [smem:[#allocation10_spill]] }
 0x2d2   : > { %p20_p2 = scmp.ge.s32.totalorder %s23_s29, 4   ;;  %s2432_s28 = sld [smem:[#allocation11_spill]] }
 0x2d3   : > { %s2433_s24 = smov %s1617_s25  ;;  %s2434_s25 = smov %s1621_s26 }
 0x2d4   : > { %s2435_s26 = smov %s1761_s14  ;;  %22 = sbr.rel (!%p20_p2) target bundleno = 10 (0xa), region = 111 }
 0x2d9   :  { %1206 = vsyncpa [#allocation3], 1 }
 0x2da   :  { %1208 = vsyncpa [#allocation3 + $0x1], 1 }
 0x2db   :  { %1209 = vsyncpa [#allocation5], 1 }
 0x2dc   :  { %1211 = vsyncpa [#allocation5 + $0x1], 1 }

</bundles_post_ra>
